<compile_context>
chip_gen: v7x
topology: tpu7x:2x2x1
jax: 0.10.0
libtpu: 0.0.40
codegen_flags: <defaults>
</compile_context>

<pallas_src>
import functools

import jax
import jax.numpy as jnp
from jax.experimental import pallas as pl
from jax.experimental.pallas import tpu as pltpu


def _round_up(x, m):
    return (x + m - 1) // m * m


def _pick_tile(dim, candidates=(512, 256, 128)):
    """Largest candidate tile that evenly divides `dim` (dim is a multiple of 128)."""
    for t in candidates:
        if dim % t == 0:
            return t
    return 128


# --------------------------------------------------------------------------------------
# Fused matmul kernel:  out = [relu]( (A @ B) * scale + shift [+ residual] )
# Used for: 1x1 convs (+ folded BN, + residual merge), conv1 via im2col, and the FC head.
# --------------------------------------------------------------------------------------
def _mm_kernel(a_ref, b_ref, s_ref, h_ref, *rest, relu, has_res):
    if has_res:
        r_ref, o_ref, acc_ref = rest
    else:
        o_ref, acc_ref = rest

    @pl.when(pl.program_id(2) == 0)
    def _():
        acc_ref[...] = jnp.zeros_like(acc_ref)

    acc_ref[...] += jnp.dot(a_ref[...], b_ref[...], preferred_element_type=jnp.float32)

    @pl.when(pl.program_id(2) == pl.num_programs(2) - 1)
    def _():
        y = acc_ref[...] * s_ref[...] + h_ref[...]
        if has_res:
            y = y + r_ref[...].astype(jnp.float32)
        if relu:
            y = jnp.maximum(y, 0.0)
        o_ref[...] = y.astype(o_ref.dtype)


def _matmul_call(a, b, scale, shift, residual, relu, out_dtype):
    M, K = a.shape
    _, N = b.shape
    # Adaptive M tile: no 16x zero-row padding for the tiny late-stage matmuls.
    tm = min(512, _round_up(M, 8))
    Mp = _round_up(M, tm)
    Kp = _round_up(K, 128)
    Np = _round_up(N, 128)
    tk = _pick_tile(Kp)
    tn = _pick_tile(Np)

    a = jnp.pad(a.astype(jnp.bfloat16), ((0, Mp - M), (0, Kp - K)))
    b = jnp.pad(b.astype(jnp.bfloat16), ((0, Kp - K), (0, Np - N)))
    sc = jnp.pad(scale.astype(jnp.float32).reshape(1, -1), ((0, 0), (0, Np - N)))
    sh = jnp.pad(shift.astype(jnp.float32).reshape(1, -1), ((0, 0), (0, Np - N)))

    inputs = [a, b, sc, sh]
    in_specs = [
        pl.BlockSpec((tm, tk), lambda i, j, k: (i, k)),
        pl.BlockSpec((tk, tn), lambda i, j, k: (k, j)),
        pl.BlockSpec((1, tn), lambda i, j, k: (0, j)),
        pl.BlockSpec((1, tn), lambda i, j, k: (0, j)),
    ]
    has_res = residual is not None
    if has_res:
        r = jnp.pad(residual.astype(jnp.bfloat16), ((0, Mp - M), (0, Np - N)))
        inputs.append(r)
        in_specs.append(pl.BlockSpec((tm, tn), lambda i, j, k: (i, j)))

    out = pl.pallas_call(
        functools.partial(_mm_kernel, relu=relu, has_res=has_res),
        out_shape=jax.ShapeDtypeStruct((Mp, Np), out_dtype),
        grid_spec=pltpu.PrefetchScalarGridSpec(
            num_scalar_prefetch=0,
            grid=(Mp // tm, Np // tn, Kp // tk),
            in_specs=in_specs,
            out_specs=pl.BlockSpec((tm, tn), lambda i, j, k: (i, j)),
            scratch_shapes=[pltpu.VMEM((tm, tn), jnp.float32)],
        ),
        compiler_params=pltpu.CompilerParams(
            dimension_semantics=("parallel", "parallel", "arbitrary")
        ),
    )(*inputs)
    return out[:M, :N]


@functools.partial(jax.jit, static_argnames=("relu", "out_dtype"))
def _mm_nores(a, b, scale, shift, *, relu, out_dtype):
    return _matmul_call(a, b, scale, shift, None, relu, out_dtype)


@functools.partial(jax.jit, static_argnames=("relu", "out_dtype"))
def _mm_res(a, b, scale, shift, residual, *, relu, out_dtype):
    return _matmul_call(a, b, scale, shift, residual, relu, out_dtype)


def matmul_fused(a, b, scale, shift, residual=None, *, relu=False, out_dtype=jnp.bfloat16):
    if residual is None:
        return _mm_nores(a, b, scale, shift, relu=relu, out_dtype=out_dtype)
    return _mm_res(a, b, scale, shift, residual, relu=relu, out_dtype=out_dtype)


# --------------------------------------------------------------------------------------
# Shifted-slab helpers for 3x3 windows (no im2col materialization).
# After zero-padding H by (1,2) and W by (1,1) and flattening (H,W), window tap (di,dj)
# of output pixel r is simply row r + di*Wp + dj of the flat slab.
# --------------------------------------------------------------------------------------
def _flatten_for_3x3(x_nhwc):
    N, H, W, C = x_nhwc.shape
    wp = W + 2
    rout = _round_up(H * wp, 8)                                   # stride-1 output rows
    rpad = _round_up(max((H + 3) * wp, rout + 2 * wp + 2), 8)     # guard for max tap shift
    xe = jnp.pad(x_nhwc, ((0, 0), (1, 2), (1, 1), (0, 0)))        # (N, H+3, W+2, C)
    xflat = xe.reshape(N, (H + 3) * wp, C)
    xflat = jnp.pad(xflat, ((0, 0), (0, rpad - (H + 3) * wp), (0, 0)))
    return xflat, wp, rout, rpad


# Fused 3x3/stride-1/pad-1 conv + folded-BN affine (+ReLU).
def _conv3x3_kernel(x_ref, w_ref, s_ref, h_ref, o_ref, acc_ref, *, wp, rout, kc, relu):
    acc_ref[...] = jnp.zeros_like(acc_ref)
    for di in range(3):
        for dj in range(3):
            off = di * wp + dj
            a = x_ref[0, off:off + rout, :]                        # shifted tap (VMEM slice)
            wk = w_ref[(di * 3 + dj) * kc:(di * 3 + dj + 1) * kc, :]
            acc_ref[...] += jnp.dot(a, wk, preferred_element_type=jnp.float32)
    y = acc_ref[...] * s_ref[...] + h_ref[...]
    if relu:
        y = jnp.maximum(y, 0.0)
    o_ref[0] = y.astype(o_ref.dtype)


@functools.partial(jax.jit, static_argnames=("relu",))
def conv3x3_s1_bn(x_nhwc, w, scale, shift, *, relu):
    N, H, W, C = x_nhwc.shape
    cout = w.shape[-1]
    coutp = _round_up(cout, 128)
    xflat, wp, rout, rpad = _flatten_for_3x3(x_nhwc.astype(jnp.bfloat16))
    wmat = jnp.pad(w.astype(jnp.bfloat16).reshape(9 * C, cout), ((0, 0), (0, coutp - cout)))
    sc = jnp.pad(scale.astype(jnp.float32).reshape(1, -1), ((0, 0), (0, coutp - cout)))
    sh = jnp.pad(shift.astype(jnp.float32).reshape(1, -1), ((0, 0), (0, coutp - cout)))
    tn = _pick_tile(coutp, (256, 128))

    out = pl.pallas_call(
        functools.partial(_conv3x3_kernel, wp=wp, rout=rout, kc=C, relu=relu),
        out_shape=jax.ShapeDtypeStruct((N, rout, coutp), jnp.bfloat16),
        grid_spec=pltpu.PrefetchScalarGridSpec(
            num_scalar_prefetch=0,
            grid=(N, coutp // tn),
            in_specs=[
                pl.BlockSpec((1, rpad, C), lambda n, j: (n, 0, 0)),
                pl.BlockSpec((9 * C, tn), lambda n, j: (0, j)),
                pl.BlockSpec((1, tn), lambda n, j: (0, j)),
                pl.BlockSpec((1, tn), lambda n, j: (0, j)),
            ],
            out_specs=pl.BlockSpec((1, rout, tn), lambda n, j: (n, 0, j)),
            scratch_shapes=[pltpu.VMEM((rout, tn), jnp.float32)],
        ),
        compiler_params=pltpu.CompilerParams(
            dimension_semantics=("parallel", "parallel")
        ),
    )(xflat, wmat, sc, sh)
    # Valid stride-1 outputs live at flat rows oh*wp + ow.
    y = out[:, :H * wp, :cout].reshape(N, H, wp, cout)[:, :, :W, :]
    return y


def conv3x3_bn(x_nhwc, w, scale, shift, *, stride=1, relu=True):
    # Stride-2 3x3 convs (3 small layers) reuse the stride-1 kernel and subsample:
    # much cheaper than a 9x im2col HBM blow-up; the 4x extra MXU work is negligible.
    y = conv3x3_s1_bn(x_nhwc, w, scale, shift, relu=relu)
    if stride > 1:
        y = y[:, ::stride, ::stride, :]
    return y


# 3x3/stride-2 max-pool via the same shifted-slab trick (running max over the 9 taps).
# Zero padding is equivalent to -inf padding here because the input is post-ReLU (>= 0).
def _maxpool3x3_kernel(x_ref, o_ref, *, wp, rout):
    m = x_ref[0, 0:rout, :]
    for di in range(3):
        for dj in range(3):
            off = di * wp + dj
            if off == 0:
                continue
            m = jnp.maximum(m, x_ref[0, off:off + rout, :])
    o_ref[0] = m


@jax.jit
def maxpool_3x3_s2(x_nhwc):
    N, H, W, C = x_nhwc.shape
    xflat, wp, rout, rpad = _flatten_for_3x3(x_nhwc)
    out = pl.pallas_call(
        functools.partial(_maxpool3x3_kernel, wp=wp, rout=rout),
        out_shape=jax.ShapeDtypeStruct((N, rout, C), x_nhwc.dtype),
        grid=(N,),
        in_specs=[pl.BlockSpec((1, rpad, C), lambda n: (n, 0, 0))],
        out_specs=pl.BlockSpec((1, rout, C), lambda n: (n, 0, 0)),
        compiler_params=pltpu.CompilerParams(dimension_semantics=("parallel",)),
    )(xflat)
    # Stride-1 3x3 max map at flat rows oh*wp + ow; stride-2 subsample in both dims.
    y = out[:, :H * wp, :].reshape(N, H, wp, C)[:, 0:H:2, 0:W:2, :]
    return y


# Global average pool (AdaptiveAvgPool2d((1,1))).
def _gap_kernel(x_ref, o_ref, *, hw):
    o_ref[...] = jnp.sum(x_ref[...].astype(jnp.float32), axis=1) * (1.0 / hw)


@jax.jit
def global_avgpool(x_nhwc):
    # TODO(synk): single-block kernel; for large N*H*W*C this should be tiled over a grid.
    N, H, W, C = x_nhwc.shape
    x3 = x_nhwc.reshape(N, H * W, C)
    return pl.pallas_call(
        functools.partial(_gap_kernel, hw=H * W),
        out_shape=jax.ShapeDtypeStruct((N, C), jnp.float32),
    )(x3)


# --------------------------------------------------------------------------------------
# Conv wrappers / ResNet-50 structure
# --------------------------------------------------------------------------------------
def _im2col(x_nhwc, kh, kw, stride, pad):
    N, H, W, C = x_nhwc.shape
    xp = jnp.pad(x_nhwc, ((0, 0), (pad, pad), (pad, pad), (0, 0)))
    OH = (H + 2 * pad - kh) // stride + 1
    OW = (W + 2 * pad - kw) // stride + 1
    views = []
    for i in range(kh):
        for j in range(kw):
            views.append(xp[:, i:i + stride * OH:stride, j:j + stride * OW:stride, :])
    cols = jnp.concatenate(views, axis=-1)
    return cols.reshape(N * OH * OW, kh * kw * C), OH, OW


@functools.partial(jax.jit, static_argnames=("stride", "pad", "relu"))
def conv_im2col_bn(x_nhwc, w, scale, shift, *, stride, pad, relu):
    """Used only for the 7x7 stem conv (Cin=3, runs once; im2col blow-up is tiny)."""
    N = x_nhwc.shape[0]
    kh, kw, cin, cout = w.shape
    cols, oh, ow = _im2col(x_nhwc.astype(jnp.bfloat16), kh, kw, stride, pad)
    y = matmul_fused(cols, w.reshape(kh * kw * cin, cout), scale, shift, relu=relu)
    return y.reshape(N, oh, ow, cout)


def conv1x1_bn(x_nhwc, w, scale, shift, *, stride=1, relu=False, residual=None):
    """1x1 conv + folded BN (+ReLU), optional fused residual add (bottleneck merge)."""
    if stride > 1:
        x_nhwc = x_nhwc[:, ::stride, ::stride, :]
    N, H, W, C = x_nhwc.shape
    cout = w.shape[-1]
    res = None if residual is None else residual.reshape(N * H * W, cout)
    y = matmul_fused(x_nhwc.reshape(N * H * W, C), w.reshape(-1, cout),
                     scale, shift, residual=res, relu=relu)
    return y.reshape(N, H, W, cout)


def bottleneck(x, bp):
    s = bp["stride"]
    # Identity / downsample branch first so it can be fused into conv3's epilogue.
    if "down_w" in bp:
        identity = conv1x1_bn(x, bp["down_w"], *bp["down_bn"], stride=s, relu=False)
    else:
        identity = x
    out = conv1x1_bn(x, bp["conv1_w"], *bp["bn1"], relu=True)
    out = conv3x3_bn(out, bp["conv2_w"], *bp["bn2"], stride=s, relu=True)
    # conv3 + bn3 + residual add + ReLU, all in one matmul epilogue.
    out = conv1x1_bn(out, bp["conv3_w"], *bp["bn3"], relu=True, residual=identity)
    return out


# --------------------------------------------------------------------------------------
# Deterministic synthetic parameters (ResNet-50 shapes; not a checkpoint)
# --------------------------------------------------------------------------------------
class _KeyGen:
    def __init__(self, seed):
        self._key = jax.random.PRNGKey(seed)

    def __call__(self):
        self._key, k = jax.random.split(self._key)
        return k


def _conv_w(kg, kh, kw, cin, cout):
    fan_in = kh * kw * cin
    w = jax.random.normal(kg(), (kh, kw, cin, cout), jnp.float32) * (2.0 / fan_in) ** 0.5
    return w.astype(jnp.bfloat16)          # bf16 weights: MXU-native, half the HBM bytes


def _bn(kg, c, eps=1e-5):
    gamma = 1.0 + 0.1 * jax.random.normal(kg(), (c,), jnp.float32)
    beta = 0.1 * jax.random.normal(kg(), (c,), jnp.float32)
    mean = 0.1 * jax.random.normal(kg(), (c,), jnp.float32)
    var = 1.0 + jax.random.uniform(kg(), (c,), jnp.float32)
    scale = gamma / jnp.sqrt(var + eps)     # eval-mode BN folded to scale/shift
    shift = beta - mean * scale
    return scale, shift


def make_params(seed=0):
    kg = _KeyGen(seed)
    n_class = 200
    params = {"conv1_w": _conv_w(kg, 7, 7, 3, 64), "bn1": _bn(kg, 64)}
    inplanes = 64
    layers = []
    for planes, nblocks, stride in [(64, 3, 1), (128, 4, 2), (256, 6, 2), (512, 3, 2)]:
        blocks = []
        for b in range(nblocks):
            s = stride if b == 0 else 1
            bp = {
                "stride": s,
                "conv1_w": _conv_w(kg, 1, 1, inplanes, planes),
                "bn1": _bn(kg, planes),
                "conv2_w": _conv_w(kg, 3, 3, planes, planes),
                "bn2": _bn(kg, planes),
                "conv3_w": _conv_w(kg, 1, 1, planes, planes * 4),
                "bn3": _bn(kg, planes * 4),
            }
            if s != 1 or inplanes != planes * 4:
                bp["down_w"] = _conv_w(kg, 1, 1, inplanes, planes * 4)
                bp["down_bn"] = _bn(kg, planes * 4)
            inplanes = planes * 4
            blocks.append(bp)
        layers.append(blocks)
    params["layers"] = layers
    params["fc_w"] = (jax.random.normal(kg(), (512 * 4, n_class), jnp.float32)
                      * (1.0 / (512 * 4) ** 0.5)).astype(jnp.bfloat16)
    params["fc_b"] = 0.01 * jax.random.normal(kg(), (n_class,), jnp.float32)
    return params


# --------------------------------------------------------------------------------------
# Forward pass (matches CUBResNet.forward -> base_model(x) -> (N, 200) logits)
# --------------------------------------------------------------------------------------
def cub_resnet_forward(x_nchw, params):
    x = jnp.transpose(x_nchw, (0, 2, 3, 1)).astype(jnp.bfloat16)   # NCHW -> NHWC, bf16
    x = conv_im2col_bn(x, params["conv1_w"], *params["bn1"], stride=2, pad=3, relu=True)
    x = maxpool_3x3_s2(x)
    for layer in params["layers"]:
        for bp in layer:
            x = bottleneck(x, bp)
    h = global_avgpool(x)                                          # (N, 2048) f32
    n_class = params["fc_b"].shape[0]
    # FC head with the bias fused into the matmul epilogue (scale = 1).
    logits = matmul_fused(h, params["fc_w"], jnp.ones((n_class,), jnp.float32),
                          params["fc_b"], relu=False, out_dtype=jnp.float32)
    return logits


if __name__ == "__main__":
    params = make_params(seed=0)
    x = jax.random.normal(jax.random.PRNGKey(0), (2, 3, 64, 64), jnp.float32)
    logits = cub_resnet_forward(x, params)
    logits = jax.block_until_ready(logits)
    assert logits.shape == (2, 200), logits.shape
    assert bool(jnp.all(jnp.isfinite(logits)))
    print("KERNEL_OK")
</pallas_src>

<mosaic_0001>
module attributes {stable_mosaic.version = 11 : i64} {
  func.func @_mm_kernel(%arg0: i32, %arg1: i32, %arg2: i32, %arg3: memref<512x256xbf16, #tpu.memory_space<vmem>>, %arg4: memref<256x128xbf16, #tpu.memory_space<vmem>>, %arg5: memref<1x128xf32, #tpu.memory_space<vmem>>, %arg6: memref<1x128xf32, #tpu.memory_space<vmem>>, %arg7: memref<512x128xbf16, #tpu.memory_space<vmem>>, %arg8: memref<512x128xf32, #tpu.memory_space<vmem>>) attributes {dimension_semantics = [#tpu.dimension_semantics<parallel>, #tpu.dimension_semantics<parallel>, #tpu.dimension_semantics<arbitrary>], iteration_bounds = array<i64: 4, 1, 1>, scalar_prefetch = 0 : i64, scratch_operands = 1 : i64, tpu.core_type = #tpu.core_type<tc>, window_params = [{transform_indices = @transform_0, window_bounds = array<i64: 512, 256>}, {transform_indices = @transform_1, window_bounds = array<i64: 256, 128>}, {transform_indices = @transform_2, window_bounds = array<i64: 1, 128>}, {transform_indices = @transform_3, window_bounds = array<i64: 1, 128>}, {transform_indices = @transform_4, window_bounds = array<i64: 512, 128>}]} {
    %c0_i32 = arith.constant 0 : i32
    %0 = arith.cmpi eq, %arg2, %c0_i32 : i32
    %1 = arith.extui %0 : i1 to i32
    %c0_i32_0 = arith.constant 0 : i32
    %2 = arith.cmpi ne, %1, %c0_i32_0 : i32
    scf.if %2 {
      %cst_10 = arith.constant 0.000000e+00 : f32
      %12 = vector.broadcast %cst_10 : f32 to vector<512x128xf32>
      %c0_11 = arith.constant 0 : index
      %c0_12 = arith.constant 0 : index
      %13 = vector.load %arg8[%c0_11, %c0_12] : memref<512x128xf32, #tpu.memory_space<vmem>>, vector<512x128xf32>
      tpu.vector_store %arg8[%c0_11, %c0_12], %12 {strides = array<i32>} : memref<512x128xf32, #tpu.memory_space<vmem>>, vector<512x128xf32>,
    } else {
    }
    %c0 = arith.constant 0 : index
    %c0_1 = arith.constant 0 : index
    %3 = vector.load %arg8[%c0, %c0_1] : memref<512x128xf32, #tpu.memory_space<vmem>>, vector<512x128xf32>
    %c0_2 = arith.constant 0 : index
    %c0_3 = arith.constant 0 : index
    %4 = vector.load %arg3[%c0_2, %c0_3] : memref<512x256xbf16, #tpu.memory_space<vmem>>, vector<512x256xbf16>
    %c0_4 = arith.constant 0 : index
    %c0_5 = arith.constant 0 : index
    %5 = vector.load %arg4[%c0_4, %c0_5] : memref<256x128xbf16, #tpu.memory_space<vmem>>, vector<256x128xbf16>
    %cst = arith.constant dense<0.000000e+00> : vector<512x128xf32>
    %6 = tpu.matmul %4, %5, %cst {dimension_numbers = #tpu.dot_dimension_numbers<[1], [0], [0], [1], [0, 0, 1, 1], [], []>} : vector<512x256xbf16>, vector<256x128xbf16>, vector<512x128xf32> -> vector<512x128xf32>
    %7 = arith.addf %3, %6 : vector<512x128xf32>
    %c0_6 = arith.constant 0 : index
    %c0_7 = arith.constant 0 : index
    %8 = vector.load %arg8[%c0_6, %c0_7] : memref<512x128xf32, #tpu.memory_space<vmem>>, vector<512x128xf32>
    tpu.vector_store %arg8[%c0_6, %c0_7], %7 {strides = array<i32>} : memref<512x128xf32, #tpu.memory_space<vmem>>, vector<512x128xf32>,
    %c0_i32_8 = arith.constant 0 : i32
    %9 = arith.cmpi eq, %arg2, %c0_i32_8 : i32
    %10 = arith.extui %9 : i1 to i32
    %c0_i32_9 = arith.constant 0 : i32
    %11 = arith.cmpi ne, %10, %c0_i32_9 : i32
    scf.if %11 {
      %c0_10 = arith.constant 0 : index
      %c0_11 = arith.constant 0 : index
      %12 = vector.load %arg8[%c0_10, %c0_11] : memref<512x128xf32, #tpu.memory_space<vmem>>, vector<512x128xf32>
      %c0_12 = arith.constant 0 : index
      %c0_13 = arith.constant 0 : index
      %13 = vector.load %arg5[%c0_12, %c0_13] : memref<1x128xf32, #tpu.memory_space<vmem>>, vector<1x128xf32>
      %14 = vector.broadcast %13 : vector<1x128xf32> to vector<512x128xf32>
      %15 = arith.mulf %12, %14 : vector<512x128xf32>
      %c0_14 = arith.constant 0 : index
      %c0_15 = arith.constant 0 : index
      %16 = vector.load %arg6[%c0_14, %c0_15] : memref<1x128xf32, #tpu.memory_space<vmem>>, vector<1x128xf32>
      %17 = vector.broadcast %16 : vector<1x128xf32> to vector<512x128xf32>
      %18 = arith.addf %15, %17 : vector<512x128xf32>
      %cst_16 = arith.constant 0.000000e+00 : f32
      %19 = vector.broadcast %cst_16 : f32 to vector<512x128xf32>
      %20 = arith.maximumf %18, %19 : vector<512x128xf32>
      %21 = arith.truncf %20 : vector<512x128xf32> to vector<512x128xbf16>
      %c0_17 = arith.constant 0 : index
      %c0_18 = arith.constant 0 : index
      %22 = vector.load %arg7[%c0_17, %c0_18] : memref<512x128xbf16, #tpu.memory_space<vmem>>, vector<512x128xbf16>
      tpu.vector_store %arg7[%c0_17, %c0_18], %21 {strides = array<i32>} : memref<512x128xbf16, #tpu.memory_space<vmem>>, vector<512x128xbf16>,
    } else {
    }
    return
  }
  func.func @transform_0(%arg0: i32, %arg1: i32, %arg2: i32) -> (i32, i32) {
    %c0_i32 = arith.constant 0 : i32
    return %arg0, %arg2 : i32, i32
  }
  func.func @transform_1(%arg0: i32, %arg1: i32, %arg2: i32) -> (i32, i32) {
    %c0_i32 = arith.constant 0 : i32
    return %arg2, %arg1 : i32, i32
  }
  func.func @transform_2(%arg0: i32, %arg1: i32, %arg2: i32) -> (i32, i32) {
    %c0_i32 = arith.constant 0 : i32
    %c0_i32_0 = arith.constant 0 : i32
    return %c0_i32, %arg1 : i32, i32
  }
  func.func @transform_3(%arg0: i32, %arg1: i32, %arg2: i32) -> (i32, i32) {
    %c0_i32 = arith.constant 0 : i32
    %c0_i32_0 = arith.constant 0 : i32
    return %c0_i32, %arg1 : i32, i32
  }
  func.func @transform_4(%arg0: i32, %arg1: i32, %arg2: i32) -> (i32, i32) {
    %c0_i32 = arith.constant 0 : i32
    return %arg0, %arg1 : i32, i32
  }
}

</mosaic_0001>

<bundles_post_ra>
// kernel: _mm_nores.1
= control target key start
LH: loop header
LB: loop body
LE: loop exit
PB: predicated region body
PF: predicated region fallthrough
CT: control target
= control target key end

     0   :  { %s2725_s15 = smov 0   ;;  %s2727_s16 = smov 0   ;;  %s3080_s0 = inlined_call_operand.vmem [shape: bf16[2048,256], index: 0, kind: input, shape index: {}]   ;;  %s3081_s1 = inlined_call_operand.vmem [shape: bf16[256,128], index: 1, kind: input, shape index: {}]   ;;  %s3082_s2 = inlined_call_operand.vmem [shape: f32[1,128], index: 2, kind: input, shape index: {}]   ;;  %s3083_s3 = inlined_call_operand.vmem [shape: f32[1,128], index: 3, kind: input, shape index: {}]   ;;  %s3084_s4 = inlined_call_operand.vmem [shape: bf16[2048,128], index: 4, kind: output, shape index: {}]  }
   0x1   :  { %s2729_s17 = smov 0  }
   0x2 LB: > { %s33_s18 = sadd.s32 1, %s2693_s16  ;;  %p2096_p0 = scmp.ge.s32.totalorder %s2697_s17, 1  ;;  %s2697_s17 = sphi %s2729_s17, %s14_s17   ;;  %s2693_s16 = sphi %s2727_s16, %s3086_s16   ;;  %s2689_s15 = sphi %s2725_s15, %s3085_s15  }
   0x3   : > { %p35_p1 = scmp.ge.s32.totalorder %s33_s18, 4  ;;  %p224_p2 = scmp.lt.s32.totalorder %s2697_s17, 5 }
   0x5   : > { %s3088_s18 = smov (%p35_p1, %s33_s18), 0  ;;  %p225_p3 = pnand %p2096_p0, %p224_p2 }
   0x6   : > { %v2563_v0 = vld [vmem:[%s3081_s1] sm:$0xff] (!%p225_p3)   ;;  %v2699_v1 = vmov (!%p225_p3), 0   ;;  %s2097_s21 = sshll.u32 (!%p225_p3), %s2689_s15, 6  ;;  %v2564_v2 = vld [vmem:[%s3081_s1 + $0x8] sm:$0xff] (!%p225_p3)   ;;  %v2565_v3 = vld [vmem:[%s3081_s1 + $0x10] sm:$0xff] (!%p225_p3)  }
   0x7   : > { %228 = sbr.rel (%p225_p3) target bundleno = 415 (0x19f), region = 36  ;;  %953 = vmatprep.subr.bf16.mxu0 (!%p225_p3), %v2699_v1  ;;  %2506 = vmatprep.subr.bf16.mxu1 (!%p225_p3), %v2699_v1  ;;  %p274_p4 = scmp.lt.s32.totalorder (!%p225_p3), %s2097_s21, 255  ;;  %v2566_v4 = vld [vmem:[%s3081_s1 + $0x18] sm:$0xff] (!%p225_p3)   ;;  %v2567_v5 = vld [vmem:[%s3081_s1 + $0x20] sm:$0xff] (!%p225_p3)   ;;  %v2568_v7 = vld [vmem:[%s3081_s1 + $0x28] sm:$0xff] (!%p225_p3)  }
   0x8   : > { %954 = vmatpush1.bf16.msra.mxu0 (!%p225_p3), %v2563_v0  ;;  %2522 = vmatpush1.bf16.msra.mxu1 (!%p225_p3), %v2563_v0  ;;  %v2569_v9 = vld [vmem:[%s3081_s1 + $0x30] sm:$0xff] (!%p225_p3)   ;;  %v2570_v10 = vld [vmem:[%s3081_s1 + $0x38] sm:$0xff] (!%p225_p3)   ;;  %v2571_v11 = vld [vmem:[%s3081_s1 + $0x40] sm:$0xff] (!%p225_p3)  }
   0x9   : > { %955 = vmatprep.subr.bf16.mxu0 (!%p225_p3), %v2699_v1  ;;  %2507 = vmatprep.subr.bf16.mxu1 (!%p225_p3), %v2699_v1  ;;  %v2572_v12 = vld [vmem:[%s3081_s1 + $0x48] sm:$0xff] (!%p225_p3)   ;;  %v2573_v13 = vld [vmem:[%s3081_s1 + $0x50] sm:$0xff] (!%p225_p3)   ;;  %v2574_v14 = vld [vmem:[%s3081_s1 + $0x58] sm:$0xff] (!%p225_p3)  }
   0xa   : > { %v2575_v15 = vld [vmem:[%s3081_s1 + $0x60] sm:$0xff] (!%p225_p3)   ;;  %v2576_v16 = vld [vmem:[%s3081_s1 + $0x68] sm:$0xff] (!%p225_p3)   ;;  %v2577_v17 = vld [vmem:[%s3081_s1 + $0x70] sm:$0xff] (!%p225_p3)  }
   0xb   : > { %v2578_v18 = vld [vmem:[%s3081_s1 + $0x78] sm:$0xff] (!%p225_p3)  }
   0xc   : > { %956 = vmatpush1.bf16.msra.mxu0 (!%p225_p3), %v2564_v2  ;;  %2523 = vmatpush1.bf16.msra.mxu1 (!%p225_p3), %v2564_v2 }
   0xd   : > { %957 = vmatprep.subr.bf16.mxu0 (!%p225_p3), %v2699_v1  ;;  %2508 = vmatprep.subr.bf16.mxu1 (!%p225_p3), %v2699_v1 }
   0xe   : > { %s3090_s21 = smov (!%p274_p4, %s2097_s21), 255 }
   0xf   : > { %s2250_s28 = sshll.u32 %s3090_s21, 3 }
  0x10   : > { %958 = vmatpush1.bf16.msra.mxu0 %v2565_v3  ;;  %2524 = vmatpush1.bf16.msra.mxu1 %v2565_v3  ;;  %s2772_s7 = scalar_lea.vmem %s3080_s0, %s2250_s28 }
  0x11   : > { %959 = vmatprep.subr.bf16.mxu0 %v2699_v1  ;;  %2509 = vmatprep.subr.bf16.mxu1 %v2699_v1  ;;  %v2581_v6 = vld [vmem:[%s2772_s7 + $0x4] ss:$8 sps:$4 sm:$0xff]   ;;  %v2579_v19 = vld [vmem:[%s2772_s7] ss:$8 sps:$4 sm:$0xff]   ;;  %v2585_v21 = vld [vmem:[%s2772_s7 + $0x14] ss:$8 sps:$4 sm:$0xff]  }
  0x12   : > { %v2584_v8 = vld [vmem:[%s2772_s7 + $0x104] ss:$8 sps:$4 sm:$0xff]   ;;  %985 = vmatprep.mubr.bf16.mxu0 %v2581_v6  ;;  %v2582_v20 = vld [vmem:[%s2772_s7 + $0x100] ss:$8 sps:$4 sm:$0xff]   ;;  %v2587_v22 = vld [vmem:[%s2772_s7 + $0x114] ss:$8 sps:$4 sm:$0xff]  }
  0x13   : > { %1113 = vmatprep.mubr.bf16.mxu1 %v2584_v8  ;;  %v2589_v23 = vld [vmem:[%s2772_s7 + $0x10] ss:$8 sps:$4 sm:$0xff]   ;;  %v2591_v25 = vld [vmem:[%s2772_s7 + $0x24] ss:$8 sps:$4 sm:$0xff]   ;;  %v2595_v27 = vld [vmem:[%s2772_s7 + $0x20] ss:$8 sps:$4 sm:$0xff]  }
  0x14   : > { %960 = vmatpush1.bf16.msra.mxu0 %v2566_v4  ;;  %2525 = vmatpush1.bf16.msra.mxu1 %v2566_v4  ;;  %v2590_v24 = vld [vmem:[%s2772_s7 + $0x110] ss:$8 sps:$4 sm:$0xff]   ;;  %v2593_v26 = vld [vmem:[%s2772_s7 + $0x124] ss:$8 sps:$4 sm:$0xff]   ;;  %v2596_v28 = vld [vmem:[%s2772_s7 + $0x120] ss:$8 sps:$4 sm:$0xff]  }
  0x15   : > { %961 = vmatprep.subr.bf16.mxu0 %v2699_v1  ;;  %2510 = vmatprep.subr.bf16.mxu1 %v2699_v1  ;;  %v2597_v29 = vld [vmem:[%s2772_s7 + $0x34] ss:$8 sps:$4 sm:$0xff]   ;;  %v2601_v31 = vld [vmem:[%s2772_s7 + $0x30] ss:$8 sps:$4 sm:$0xff]   ;;  %v2603_v33 = vld [vmem:[%s2772_s7 + $0x44] ss:$8 sps:$4 sm:$0xff]  }
  0x16   : > { %v2599_v30 = vld [vmem:[%s2772_s7 + $0x134] ss:$8 sps:$4 sm:$0xff]   ;;  %v2602_v32 = vld [vmem:[%s2772_s7 + $0x130] ss:$8 sps:$4 sm:$0xff]   ;;  %v2605_v34 = vld [vmem:[%s2772_s7 + $0x144] ss:$8 sps:$4 sm:$0xff]  }
  0x17   : > { %v2607_v35 = vld [vmem:[%s2772_s7 + $0x40] ss:$8 sps:$4 sm:$0xff]   ;;  %v2609_v37 = vld [vmem:[%s2772_s7 + $0x54] ss:$8 sps:$4 sm:$0xff]   ;;  %v2613_v39 = vld [vmem:[%s2772_s7 + $0x50] ss:$8 sps:$4 sm:$0xff]  }
  0x18   : > { %962 = vmatpush1.bf16.msra.mxu0 %v2567_v5  ;;  %2526 = vmatpush1.bf16.msra.mxu1 %v2567_v5  ;;  %v2608_v36 = vld [vmem:[%s2772_s7 + $0x140] ss:$8 sps:$4 sm:$0xff]   ;;  %v2611_v38 = vld [vmem:[%s2772_s7 + $0x154] ss:$8 sps:$4 sm:$0xff]   ;;  %v2614_v40 = vld [vmem:[%s2772_s7 + $0x150] ss:$8 sps:$4 sm:$0xff]  }
  0x19   : > { %963 = vmatprep.subr.bf16.mxu0 %v2699_v1  ;;  %2511 = vmatprep.subr.bf16.mxu1 %v2699_v1  ;;  %v2615_v41 = vld [vmem:[%s2772_s7 + $0x64] ss:$8 sps:$4 sm:$0xff]   ;;  %v2619_v43 = vld [vmem:[%s2772_s7 + $0x60] ss:$8 sps:$4 sm:$0xff]   ;;  %v2621_v45 = vld [vmem:[%s2772_s7 + $0x74] ss:$8 sps:$4 sm:$0xff]  }
  0x1a   : > { %v2617_v42 = vld [vmem:[%s2772_s7 + $0x164] ss:$8 sps:$4 sm:$0xff]   ;;  %v2620_v44 = vld [vmem:[%s2772_s7 + $0x160] ss:$8 sps:$4 sm:$0xff]   ;;  %v2623_v46 = vld [vmem:[%s2772_s7 + $0x174] ss:$8 sps:$4 sm:$0xff]  }
  0x1b   : > { %v2625_v47 = vld [vmem:[%s2772_s7 + $0x70] ss:$8 sps:$4 sm:$0xff]   ;;  %v2627_v49 = vld [vmem:[%s2772_s7 + $0x84] ss:$8 sps:$4 sm:$0xff]   ;;  %v2631_v51 = vld [vmem:[%s2772_s7 + $0x80] ss:$8 sps:$4 sm:$0xff]  }
  0x1c   : > { %964 = vmatpush1.bf16.msra.mxu0 %v2568_v7  ;;  %2527 = vmatpush1.bf16.msra.mxu1 %v2568_v7  ;;  %v2626_v48 = vld [vmem:[%s2772_s7 + $0x170] ss:$8 sps:$4 sm:$0xff]   ;;  %v2629_v50 = vld [vmem:[%s2772_s7 + $0x184] ss:$8 sps:$4 sm:$0xff]   ;;  %v2632_v52 = vld [vmem:[%s2772_s7 + $0x180] ss:$8 sps:$4 sm:$0xff]  }
  0x1d   : > { %965 = vmatprep.subr.bf16.mxu0 %v2699_v1  ;;  %2512 = vmatprep.subr.bf16.mxu1 %v2699_v1  ;;  %v2633_v53 = vld [vmem:[%s2772_s7 + $0x94] ss:$8 sps:$4 sm:$0xff]   ;;  %v2637_v55 = vld [vmem:[%s2772_s7 + $0x90] ss:$8 sps:$4 sm:$0xff]   ;;  %v2639_v57 = vld [vmem:[%s2772_s7 + $0xa4] ss:$8 sps:$4 sm:$0xff]  }
  0x1e   : > { %v2635_v54 = vld [vmem:[%s2772_s7 + $0x194] ss:$8 sps:$4 sm:$0xff]   ;;  %v2638_v56 = vld [vmem:[%s2772_s7 + $0x190] ss:$8 sps:$4 sm:$0xff]   ;;  %v2641_v58 = vld [vmem:[%s2772_s7 + $0x1a4] ss:$8 sps:$4 sm:$0xff]  }
  0x1f   : > { %v2643_v59 = vld [vmem:[%s2772_s7 + $0xa0] ss:$8 sps:$4 sm:$0xff]   ;;  %v2645_v61 = vld [vmem:[%s2772_s7 + $0xb4] ss:$8 sps:$4 sm:$0xff]   ;;  %v2649_v63 = vld [vmem:[%s2772_s7 + $0xb0] ss:$8 sps:$4 sm:$0xff]  }
  0x20   : > { %966 = vmatpush1.bf16.msra.mxu0 %v2569_v9  ;;  %2528 = vmatpush1.bf16.msra.mxu1 %v2569_v9  ;;  %v2644_v60 = vld [vmem:[%s2772_s7 + $0x1a0] ss:$8 sps:$4 sm:$0xff]   ;;  %v2647_v62 = vld [vmem:[%s2772_s7 + $0x1b4] ss:$8 sps:$4 sm:$0xff]   ;;  %v2650_v0 = vld [vmem:[%s2772_s7 + $0x1b0] ss:$8 sps:$4 sm:$0xff]  }
  0x21   : > { %967 = vmatprep.subr.bf16.mxu0 %v2699_v1  ;;  %2513 = vmatprep.subr.bf16.mxu1 %v2699_v1  ;;  %v2653_v2 = vld [vmem:[%s2772_s7 + $0x1c4] ss:$8 sps:$4 sm:$0xff]   ;;  %v2655_v3 = vld [vmem:[%s2772_s7 + $0xc0] ss:$8 sps:$4 sm:$0xff]   ;;  %v2657_v5 = vld [vmem:[%s2772_s7 + $0xd4] ss:$8 sps:$4 sm:$0xff]  }
  0x22   : > { %v2656_v4 = vld [vmem:[%s2772_s7 + $0x1c0] ss:$8 sps:$4 sm:$0xff]   ;;  %v2659_v6 = vld [vmem:[%s2772_s7 + $0x1d4] ss:$8 sps:$4 sm:$0xff]   ;;  %v2661_v7 = vld [vmem:[%s2772_s7 + $0xd0] ss:$8 sps:$4 sm:$0xff]  }
  0x23   : > { %v2662_v8 = vld [vmem:[%s2772_s7 + $0x1d0] ss:$8 sps:$4 sm:$0xff]   ;;  %v2663_v9 = vld [vmem:[%s2772_s7 + $0xe4] ss:$8 sps:$4 sm:$0xff]  }
  0x24   : > { %968 = vmatpush1.bf16.msra.mxu0 %v2570_v10  ;;  %2529 = vmatpush1.bf16.msra.mxu1 %v2570_v10  ;;  %v2665_v10 = vld [vmem:[%s2772_s7 + $0x1e4] ss:$8 sps:$4 sm:$0xff]  }
  0x25   : > { %969 = vmatprep.subr.bf16.mxu0 %v2699_v1  ;;  %2514 = vmatprep.subr.bf16.mxu1 %v2699_v1 }
  0x28   : > { %970 = vmatpush1.bf16.msra.mxu0 %v2571_v11  ;;  %2530 = vmatpush1.bf16.msra.mxu1 %v2571_v11  ;;  %v2667_v11 = vld [vmem:[%s2772_s7 + $0xe0] ss:$8 sps:$4 sm:$0xff]  }
  0x29   : > { %971 = vmatprep.subr.bf16.mxu0 %v2699_v1  ;;  %2515 = vmatprep.subr.bf16.mxu1 %v2699_v1 }
  0x2c   : > { %972 = vmatpush1.bf16.msra.mxu0 %v2572_v12  ;;  %2531 = vmatpush1.bf16.msra.mxu1 %v2572_v12  ;;  %v2668_v12 = vld [vmem:[%s2772_s7 + $0x1e0] ss:$8 sps:$4 sm:$0xff]  }
  0x2d   : > { %973 = vmatprep.subr.bf16.mxu0 %v2699_v1  ;;  %2516 = vmatprep.subr.bf16.mxu1 %v2699_v1 }
  0x30   : > { %974 = vmatpush1.bf16.msra.mxu0 %v2573_v13  ;;  %2532 = vmatpush1.bf16.msra.mxu1 %v2573_v13  ;;  %v2669_v13 = vld [vmem:[%s2772_s7 + $0xf4] ss:$8 sps:$4 sm:$0xff]  }
  0x31   : > { %975 = vmatprep.subr.bf16.mxu0 %v2699_v1  ;;  %2517 = vmatprep.subr.bf16.mxu1 %v2699_v1 }
  0x34   : > { %976 = vmatpush1.bf16.msra.mxu0 %v2574_v14  ;;  %2533 = vmatpush1.bf16.msra.mxu1 %v2574_v14  ;;  %v2671_v14 = vld [vmem:[%s2772_s7 + $0x1f4] ss:$8 sps:$4 sm:$0xff]  }
  0x35   : > { %977 = vmatprep.subr.bf16.mxu0 %v2699_v1  ;;  %2518 = vmatprep.subr.bf16.mxu1 %v2699_v1 }
  0x38   : > { %978 = vmatpush1.bf16.msra.mxu0 %v2575_v15  ;;  %2534 = vmatpush1.bf16.msra.mxu1 %v2575_v15  ;;  %v2673_v15 = vld [vmem:[%s2772_s7 + $0xf0] ss:$8 sps:$4 sm:$0xff]  }
  0x39   : > { %979 = vmatprep.subr.bf16.mxu0 %v2699_v1  ;;  %2519 = vmatprep.subr.bf16.mxu1 %v2699_v1 }
  0x3c   : > { %980 = vmatpush1.bf16.msra.mxu0 %v2576_v16  ;;  %2535 = vmatpush1.bf16.msra.mxu1 %v2576_v16  ;;  %v2674_v16 = vld [vmem:[%s2772_s7 + $0x1f0] ss:$8 sps:$4 sm:$0xff]  }
  0x3d   : > { %981 = vmatprep.subr.bf16.mxu0 %v2699_v1  ;;  %2520 = vmatprep.subr.bf16.mxu1 %v2699_v1 }
  0x40   : > { %982 = vmatpush1.bf16.msra.mxu0 %v2577_v17  ;;  %2536 = vmatpush1.bf16.msra.mxu1 %v2577_v17  ;;  %v2898_v17 = vld [vmem:[%s3082_s2] ss:$0 sm:$0xff] }
  0x41   : > { %983 = vmatprep.subr.bf16.mxu0 %v2699_v1  ;;  %2521 = vmatprep.subr.bf16.mxu1 %v2699_v1  ;;  %v2651_v1 = vld [vmem:[%s2772_s7 + $0xc4] ss:$8 sps:$4 sm:$0xff]   ;;  %s2101_s7 = sshll.u32 %s3090_s21, 2 }
  0x42   : > { %s2917_s15 = scalar_lea.vmem %s3084_s4, %s2101_s7 }
  0x44   : > { %984 = vmatpush1.bf16.msra.mxu0 %v2578_v18  ;;  %2537 = vmatpush1.bf16.msra.mxu1 %v2578_v18 }
  0x47   : > { %986 = vmatmul.mubr.bf16.vlgmr.msra.gmra.mrb[0].mxu0 %v2579_v19  ;;  %1114 = vmatmul.mubr.bf16.vlgmr.msra.gmra.mrb[0].mxu1 %v2582_v20  ;;  %v2903_v19 = vld [vmem:[%s3083_s3] ss:$0 sm:$0xff] }
  0x48   : > { %993 = vmatprep.mubr.bf16.mxu0 %v2585_v21  ;;  %1121 = vmatprep.mubr.bf16.mxu1 %v2587_v22 }
  0x4f   : > { %994 = vmatmul.mubr.bf16.gmra.mrb[4].mxu0 %v2589_v23  ;;  %1122 = vmatmul.mubr.bf16.gmra.mrb[4].mxu1 %v2590_v24 }
  0x50   : > { %1001 = vmatprep.mubr.bf16.mxu0 %v2591_v25  ;;  %1129 = vmatprep.mubr.bf16.mxu1 %v2593_v26 }
  0x57   : > { %1002 = vmatmul.mubr.bf16.gmra.mrb[8].mxu0 %v2595_v27  ;;  %1130 = vmatmul.mubr.bf16.gmra.mrb[8].mxu1 %v2596_v28 }
  0x58   : > { %1009 = vmatprep.mubr.bf16.mxu0 %v2597_v29  ;;  %1137 = vmatprep.mubr.bf16.mxu1 %v2599_v30 }
  0x5f   : > { %1010 = vmatmul.mubr.bf16.gmra.mrb[12].mxu0 %v2601_v31  ;;  %1138 = vmatmul.mubr.bf16.gmra.mrb[12].mxu1 %v2602_v32 }
  0x60   : > { %1017 = vmatprep.mubr.bf16.mxu0 %v2603_v33  ;;  %1145 = vmatprep.mubr.bf16.mxu1 %v2605_v34 }
  0x67   : > { %1018 = vmatmul.mubr.bf16.gmra.mrb[16].mxu0 %v2607_v35  ;;  %1146 = vmatmul.mubr.bf16.gmra.mrb[16].mxu1 %v2608_v36 }
  0x68   : > { %1025 = vmatprep.mubr.bf16.mxu0 %v2609_v37  ;;  %1153 = vmatprep.mubr.bf16.mxu1 %v2611_v38 }
  0x6f   : > { %1026 = vmatmul.mubr.bf16.gmra.mrb[20].mxu0 %v2613_v39  ;;  %1154 = vmatmul.mubr.bf16.gmra.mrb[20].mxu1 %v2614_v40 }
  0x70   : > { %1033 = vmatprep.mubr.bf16.mxu0 %v2615_v41  ;;  %1161 = vmatprep.mubr.bf16.mxu1 %v2617_v42 }
  0x77   : > { %1034 = vmatmul.mubr.bf16.gmra.mrb[24].mxu0 %v2619_v43  ;;  %1162 = vmatmul.mubr.bf16.gmra.mrb[24].mxu1 %v2620_v44 }
  0x78   : > { %1041 = vmatprep.mubr.bf16.mxu0 %v2621_v45  ;;  %1169 = vmatprep.mubr.bf16.mxu1 %v2623_v46 }
  0x7f   : > { %1042 = vmatmul.mubr.bf16.gmra.mrb[28].mxu0 %v2625_v47  ;;  %1170 = vmatmul.mubr.bf16.gmra.mrb[28].mxu1 %v2626_v48 }
  0x80   : > { %1049 = vmatprep.mubr.bf16.mxu0 %v2627_v49  ;;  %1177 = vmatprep.mubr.bf16.mxu1 %v2629_v50 }
  0x87   : > { %1050 = vmatmul.mubr.bf16.gmra.mrb[32].mxu0 %v2631_v51  ;;  %1178 = vmatmul.mubr.bf16.gmra.mrb[32].mxu1 %v2632_v52 }
  0x88   : > { %1057 = vmatprep.mubr.bf16.mxu0 %v2633_v53  ;;  %1185 = vmatprep.mubr.bf16.mxu1 %v2635_v54 }
  0x8f   : > { %1058 = vmatmul.mubr.bf16.gmra.mrb[36].mxu0 %v2637_v55  ;;  %1186 = vmatmul.mubr.bf16.gmra.mrb[36].mxu1 %v2638_v56 }
  0x90   : > { %1065 = vmatprep.mubr.bf16.mxu0 %v2639_v57  ;;  %1193 = vmatprep.mubr.bf16.mxu1 %v2641_v58 }
  0x97   : > { %1066 = vmatmul.mubr.bf16.gmra.mrb[40].mxu0 %v2643_v59  ;;  %1194 = vmatmul.mubr.bf16.gmra.mrb[40].mxu1 %v2644_v60 }
  0x98   : > { %1073 = vmatprep.mubr.bf16.mxu0 %v2645_v61  ;;  %1201 = vmatprep.mubr.bf16.mxu1 %v2647_v62 }
  0x9f   : > { %1074 = vmatmul.mubr.bf16.gmra.mrb[44].mxu0 %v2649_v63  ;;  %1202 = vmatmul.mubr.bf16.gmra.mrb[44].mxu1 %v2650_v0 }
  0xa0   : > { %1081 = vmatprep.mubr.bf16.mxu0 %v2651_v1  ;;  %1209 = vmatprep.mubr.bf16.mxu1 %v2653_v2 }
  0xa7   : > { %1082 = vmatmul.mubr.bf16.gmra.mrb[48].mxu0 %v2655_v3  ;;  %1210 = vmatmul.mubr.bf16.gmra.mrb[48].mxu1 %v2656_v4 }
  0xa8   : > { %1089 = vmatprep.mubr.bf16.mxu0 %v2657_v5  ;;  %1217 = vmatprep.mubr.bf16.mxu1 %v2659_v6 }
  0xaf   : > { %1090 = vmatmul.mubr.bf16.gmra.mrb[52].mxu0 %v2661_v7  ;;  %1218 = vmatmul.mubr.bf16.gmra.mrb[52].mxu1 %v2662_v8 }
  0xb0   : > { %1097 = vmatprep.mubr.bf16.mxu0 %v2663_v9  ;;  %1225 = vmatprep.mubr.bf16.mxu1 %v2665_v10 }
  0xb7   : > { %1098 = vmatmul.mubr.bf16.gmra.mrb[56].mxu0 %v2667_v11  ;;  %1226 = vmatmul.mubr.bf16.gmra.mrb[56].mxu1 %v2668_v12 }
  0xb8   : > { %1105 = vmatprep.mubr.bf16.mxu0 %v2669_v13  ;;  %1233 = vmatprep.mubr.bf16.mxu1 %v2671_v14 }
  0xbf   : > { %1106 = vmatmul.mubr.bf16.gmra.mrb[60].mxu0 %v2673_v15  ;;  %1234 = vmatmul.mubr.bf16.gmra.mrb[60].mxu1 %v2674_v16 }
 0x11a   : > { %v987_v18 = vpop.f32.mrb[0].mxu0  ;;  %v1115_v20 = vpop.f32.mrb[0].mxu1 }
 0x11b   : > { %v1444_v21 = vmul.f32 %v2898_v17, %v987_v18  ;;  %v1476_v22 = vmul.f32 %v2898_v17, %v1115_v20  ;;  %v989_v23 = vpop.f32.mrb[1].mxu0  ;;  %v1117_v24 = vpop.f32.mrb[1].mxu1 }
 0x11c   : > { %v990_v25 = vpop.f32.mrb[2].mxu0  ;;  %v1118_v26 = vpop.f32.mrb[2].mxu1 }
 0x11d   : > { %v1515_v27 = vadd.f32 %v2903_v19, %v1444_v21  ;;  %v1547_v28 = vadd.f32 %v2903_v19, %v1476_v22  ;;  %v1445_v29 = vmul.f32 %v2898_v17, %v990_v25  ;;  %v1477_v30 = vmul.f32 %v2898_v17, %v1118_v26  ;;  %v992_v31 = vpop.f32.mrb[3].mxu0  ;;  %v1120_v32 = vpop.f32.mrb[3].mxu1 }
 0x11f   : > { %v1516_v33 = vadd.f32 %v2903_v19, %v1445_v29  ;;  %v1548_v34 = vadd.f32 %v2903_v19, %v1477_v30  ;;  %v1579_v35 = vmax.f32 %v1515_v27, 0.0  ;;  %v1611_v36 = vmax.f32 %v1547_v28, 0.0 }
 0x121   : > { %v1580_v37 = vmax.f32 %v1516_v33, 0.0  ;;  %v1612_v38 = vmax.f32 %v1548_v34, 0.0 }
 0x122   : > { %v995_v39 = vpop.f32.mrb[4].mxu0  ;;  %v1123_v40 = vpop.f32.mrb[4].mxu1 }
 0x123   : > { %v2318_v41 = vpack.c.bf16 %v1580_v37, %v1579_v35  ;;  %v2398_v42 = vpack.c.bf16 %v1612_v38, %v1611_v36  ;;  %v1446_v43 = vmul.f32 %v2898_v17, %v995_v39  ;;  %v1478_v44 = vmul.f32 %v2898_v17, %v1123_v40  ;;  %v997_v45 = vpop.f32.mrb[5].mxu0  ;;  %v1125_v46 = vpop.f32.mrb[5].mxu1 }
 0x124   : > { %v998_v47 = vpop.f32.mrb[6].mxu0  ;;  %v1126_v48 = vpop.f32.mrb[6].mxu1 }
 0x125   : > { %2319 = vst [vmem:[%s2917_s15] sm:$0xff] %v2318_v41   ;;  %2490 = vst [vmem:[%s2917_s15 + $0x80] sm:$0xff] %v2398_v42   ;;  %v1517_v49 = vadd.f32 %v2903_v19, %v1446_v43  ;;  %v1549_v50 = vadd.f32 %v2903_v19, %v1478_v44  ;;  %v1447_v51 = vmul.f32 %v2898_v17, %v998_v47  ;;  %v1000_v53 = vpop.f32.mrb[7].mxu0  ;;  %v1128_v54 = vpop.f32.mrb[7].mxu1 }
 0x126   : > { %v1479_v52 = vmul.f32 %v2898_v17, %v1126_v48 }
 0x127   : > { %v1518_v55 = vadd.f32 %v2903_v19, %v1447_v51  ;;  %v1581_v57 = vmax.f32 %v1517_v49, 0.0  ;;  %v1613_v58 = vmax.f32 %v1549_v50, 0.0 }
 0x128   : > { %v1550_v56 = vadd.f32 %v2903_v19, %v1479_v52 }
 0x129   : > { %v1582_v59 = vmax.f32 %v1518_v55, 0.0 }
 0x12a   : > { %v1614_v60 = vmax.f32 %v1550_v56, 0.0  ;;  %v1003_v61 = vpop.f32.mrb[8].mxu0  ;;  %v1131_v62 = vpop.f32.mrb[8].mxu1 }
 0x12b   : > { %v2323_v63 = vpack.c.bf16 %v1582_v59, %v1581_v57  ;;  %v1448_v1 = vmul.f32 %v2898_v17, %v1003_v61  ;;  %v1480_v2 = vmul.f32 %v2898_v17, %v1131_v62  ;;  %v1005_v3 = vpop.f32.mrb[9].mxu0  ;;  %v1133_v4 = vpop.f32.mrb[9].mxu1 }
 0x12c   : > { %v2403_v0 = vpack.c.bf16 %v1614_v60, %v1613_v58  ;;  %v1006_v5 = vpop.f32.mrb[10].mxu0  ;;  %v1134_v6 = vpop.f32.mrb[10].mxu1 }
 0x12d   : > { %2475 = vst [vmem:[%s2917_s15 + $0x8] sm:$0xff] %v2323_v63   ;;  %v1519_v7 = vadd.f32 %v2903_v19, %v1448_v1  ;;  %v1551_v8 = vadd.f32 %v2903_v19, %v1480_v2  ;;  %v1449_v9 = vmul.f32 %v2898_v17, %v1006_v5  ;;  %v1481_v10 = vmul.f32 %v2898_v17, %v1134_v6  ;;  %v1008_v11 = vpop.f32.mrb[11].mxu0  ;;  %v1136_v12 = vpop.f32.mrb[11].mxu1 }
 0x12e   : > { %2491 = vst [vmem:[%s2917_s15 + $0x88] sm:$0xff] %v2403_v0  }
 0x12f   : > { %v1520_v13 = vadd.f32 %v2903_v19, %v1449_v9  ;;  %v1552_v14 = vadd.f32 %v2903_v19, %v1481_v10  ;;  %v1583_v15 = vmax.f32 %v1519_v7, 0.0  ;;  %v1615_v16 = vmax.f32 %v1551_v8, 0.0 }
 0x131   : > { %v1584_v18 = vmax.f32 %v1520_v13, 0.0  ;;  %v1616_v20 = vmax.f32 %v1552_v14, 0.0 }
 0x132   : > { %v1011_v21 = vpop.f32.mrb[12].mxu0  ;;  %v1139_v22 = vpop.f32.mrb[12].mxu1 }
 0x133   : > { %v2328_v23 = vpack.c.bf16 %v1584_v18, %v1583_v15  ;;  %v2408_v24 = vpack.c.bf16 %v1616_v20, %v1615_v16  ;;  %v1450_v25 = vmul.f32 %v2898_v17, %v1011_v21  ;;  %v1482_v26 = vmul.f32 %v2898_v17, %v1139_v22  ;;  %v1013_v27 = vpop.f32.mrb[13].mxu0  ;;  %v1141_v28 = vpop.f32.mrb[13].mxu1 }
 0x134   : > { %v1014_v29 = vpop.f32.mrb[14].mxu0  ;;  %v1142_v30 = vpop.f32.mrb[14].mxu1 }
 0x135   : > { %2476 = vst [vmem:[%s2917_s15 + $0x10] sm:$0xff] %v2328_v23   ;;  %2492 = vst [vmem:[%s2917_s15 + $0x90] sm:$0xff] %v2408_v24   ;;  %v1521_v31 = vadd.f32 %v2903_v19, %v1450_v25  ;;  %v1553_v32 = vadd.f32 %v2903_v19, %v1482_v26  ;;  %v1451_v33 = vmul.f32 %v2898_v17, %v1014_v29  ;;  %v1016_v35 = vpop.f32.mrb[15].mxu0  ;;  %v1144_v36 = vpop.f32.mrb[15].mxu1 }
 0x136   : > { %v1483_v34 = vmul.f32 %v2898_v17, %v1142_v30 }
 0x137   : > { %v1522_v37 = vadd.f32 %v2903_v19, %v1451_v33  ;;  %v1585_v39 = vmax.f32 %v1521_v31, 0.0  ;;  %v1617_v40 = vmax.f32 %v1553_v32, 0.0 }
 0x138   : > { %v1554_v38 = vadd.f32 %v2903_v19, %v1483_v34 }
 0x139   : > { %v1586_v41 = vmax.f32 %v1522_v37, 0.0 }
 0x13a   : > { %v1618_v42 = vmax.f32 %v1554_v38, 0.0  ;;  %v1019_v43 = vpop.f32.mrb[16].mxu0  ;;  %v1147_v44 = vpop.f32.mrb[16].mxu1 }
 0x13b   : > { %v2333_v45 = vpack.c.bf16 %v1586_v41, %v1585_v39  ;;  %v1452_v47 = vmul.f32 %v2898_v17, %v1019_v43  ;;  %v1484_v48 = vmul.f32 %v2898_v17, %v1147_v44  ;;  %v1021_v49 = vpop.f32.mrb[17].mxu0  ;;  %v1149_v50 = vpop.f32.mrb[17].mxu1 }
 0x13c   : > { %v2413_v46 = vpack.c.bf16 %v1618_v42, %v1617_v40  ;;  %v1022_v51 = vpop.f32.mrb[18].mxu0  ;;  %v1150_v52 = vpop.f32.mrb[18].mxu1 }
 0x13d   : > { %2477 = vst [vmem:[%s2917_s15 + $0x18] sm:$0xff] %v2333_v45   ;;  %v1523_v53 = vadd.f32 %v2903_v19, %v1452_v47  ;;  %v1555_v54 = vadd.f32 %v2903_v19, %v1484_v48  ;;  %v1453_v55 = vmul.f32 %v2898_v17, %v1022_v51  ;;  %v1485_v56 = vmul.f32 %v2898_v17, %v1150_v52  ;;  %v1024_v57 = vpop.f32.mrb[19].mxu0  ;;  %v1152_v58 = vpop.f32.mrb[19].mxu1 }
 0x13e   : > { %2493 = vst [vmem:[%s2917_s15 + $0x98] sm:$0xff] %v2413_v46  }
 0x13f   : > { %v1524_v59 = vadd.f32 %v2903_v19, %v1453_v55  ;;  %v1556_v60 = vadd.f32 %v2903_v19, %v1485_v56  ;;  %v1587_v61 = vmax.f32 %v1523_v53, 0.0  ;;  %v1619_v62 = vmax.f32 %v1555_v54, 0.0 }
 0x141   : > { %v1588_v63 = vmax.f32 %v1524_v59, 0.0  ;;  %v1620_v0 = vmax.f32 %v1556_v60, 0.0 }
 0x142   : > { %v1027_v1 = vpop.f32.mrb[20].mxu0  ;;  %v1155_v2 = vpop.f32.mrb[20].mxu1 }
 0x143   : > { %v2338_v3 = vpack.c.bf16 %v1588_v63, %v1587_v61  ;;  %v2418_v4 = vpack.c.bf16 %v1620_v0, %v1619_v62  ;;  %v1454_v5 = vmul.f32 %v2898_v17, %v1027_v1  ;;  %v1486_v6 = vmul.f32 %v2898_v17, %v1155_v2  ;;  %v1029_v7 = vpop.f32.mrb[21].mxu0  ;;  %v1157_v8 = vpop.f32.mrb[21].mxu1 }
 0x144   : > { %v1030_v9 = vpop.f32.mrb[22].mxu0  ;;  %v1158_v10 = vpop.f32.mrb[22].mxu1 }
 0x145   : > { %2478 = vst [vmem:[%s2917_s15 + $0x20] sm:$0xff] %v2338_v3   ;;  %2494 = vst [vmem:[%s2917_s15 + $0xa0] sm:$0xff] %v2418_v4   ;;  %v1525_v11 = vadd.f32 %v2903_v19, %v1454_v5  ;;  %v1557_v12 = vadd.f32 %v2903_v19, %v1486_v6  ;;  %v1455_v13 = vmul.f32 %v2898_v17, %v1030_v9  ;;  %v1032_v15 = vpop.f32.mrb[23].mxu0  ;;  %v1160_v16 = vpop.f32.mrb[23].mxu1 }
 0x146   : > { %v1487_v14 = vmul.f32 %v2898_v17, %v1158_v10 }
 0x147   : > { %v1526_v18 = vadd.f32 %v2903_v19, %v1455_v13  ;;  %v1589_v21 = vmax.f32 %v1525_v11, 0.0  ;;  %v1621_v22 = vmax.f32 %v1557_v12, 0.0 }
 0x148   : > { %v1558_v20 = vadd.f32 %v2903_v19, %v1487_v14 }
 0x149   : > { %v1590_v23 = vmax.f32 %v1526_v18, 0.0 }
 0x14a   : > { %v1622_v24 = vmax.f32 %v1558_v20, 0.0  ;;  %v1035_v25 = vpop.f32.mrb[24].mxu0  ;;  %v1163_v26 = vpop.f32.mrb[24].mxu1 }
 0x14b   : > { %v2343_v27 = vpack.c.bf16 %v1590_v23, %v1589_v21  ;;  %v1456_v29 = vmul.f32 %v2898_v17, %v1035_v25  ;;  %v1488_v30 = vmul.f32 %v2898_v17, %v1163_v26  ;;  %v1037_v31 = vpop.f32.mrb[25].mxu0  ;;  %v1165_v32 = vpop.f32.mrb[25].mxu1 }
 0x14c   : > { %v2423_v28 = vpack.c.bf16 %v1622_v24, %v1621_v22  ;;  %v1038_v33 = vpop.f32.mrb[26].mxu0  ;;  %v1166_v34 = vpop.f32.mrb[26].mxu1 }
 0x14d   : > { %2479 = vst [vmem:[%s2917_s15 + $0x28] sm:$0xff] %v2343_v27   ;;  %v1527_v35 = vadd.f32 %v2903_v19, %v1456_v29  ;;  %v1559_v36 = vadd.f32 %v2903_v19, %v1488_v30  ;;  %v1457_v37 = vmul.f32 %v2898_v17, %v1038_v33  ;;  %v1489_v38 = vmul.f32 %v2898_v17, %v1166_v34  ;;  %v1040_v39 = vpop.f32.mrb[27].mxu0  ;;  %v1168_v40 = vpop.f32.mrb[27].mxu1 }
 0x14e   : > { %2495 = vst [vmem:[%s2917_s15 + $0xa8] sm:$0xff] %v2423_v28  }
 0x14f   : > { %v1528_v41 = vadd.f32 %v2903_v19, %v1457_v37  ;;  %v1560_v42 = vadd.f32 %v2903_v19, %v1489_v38  ;;  %v1591_v43 = vmax.f32 %v1527_v35, 0.0  ;;  %v1623_v44 = vmax.f32 %v1559_v36, 0.0 }
 0x151   : > { %v1592_v45 = vmax.f32 %v1528_v41, 0.0  ;;  %v1624_v46 = vmax.f32 %v1560_v42, 0.0 }
 0x152   : > { %v1043_v47 = vpop.f32.mrb[28].mxu0  ;;  %v1171_v48 = vpop.f32.mrb[28].mxu1 }
 0x153   : > { %v2348_v49 = vpack.c.bf16 %v1592_v45, %v1591_v43  ;;  %v2428_v50 = vpack.c.bf16 %v1624_v46, %v1623_v44  ;;  %v1458_v51 = vmul.f32 %v2898_v17, %v1043_v47  ;;  %v1490_v52 = vmul.f32 %v2898_v17, %v1171_v48  ;;  %v1045_v53 = vpop.f32.mrb[29].mxu0  ;;  %v1173_v54 = vpop.f32.mrb[29].mxu1 }
 0x154   : > { %v1046_v55 = vpop.f32.mrb[30].mxu0  ;;  %v1174_v56 = vpop.f32.mrb[30].mxu1 }
 0x155   : > { %2480 = vst [vmem:[%s2917_s15 + $0x30] sm:$0xff] %v2348_v49   ;;  %2496 = vst [vmem:[%s2917_s15 + $0xb0] sm:$0xff] %v2428_v50   ;;  %v1529_v57 = vadd.f32 %v2903_v19, %v1458_v51  ;;  %v1561_v58 = vadd.f32 %v2903_v19, %v1490_v52  ;;  %v1459_v59 = vmul.f32 %v2898_v17, %v1046_v55  ;;  %v1048_v61 = vpop.f32.mrb[31].mxu0  ;;  %v1176_v62 = vpop.f32.mrb[31].mxu1 }
 0x156   : > { %v1491_v60 = vmul.f32 %v2898_v17, %v1174_v56 }
 0x157   : > { %v1530_v63 = vadd.f32 %v2903_v19, %v1459_v59  ;;  %v1593_v1 = vmax.f32 %v1529_v57, 0.0  ;;  %v1625_v2 = vmax.f32 %v1561_v58, 0.0 }
 0x158   : > { %v1562_v0 = vadd.f32 %v2903_v19, %v1491_v60 }
 0x159   : > { %v1594_v3 = vmax.f32 %v1530_v63, 0.0 }
 0x15a   : > { %v1626_v4 = vmax.f32 %v1562_v0, 0.0  ;;  %v1051_v5 = vpop.f32.mrb[32].mxu0  ;;  %v1179_v6 = vpop.f32.mrb[32].mxu1 }
 0x15b   : > { %v2353_v7 = vpack.c.bf16 %v1594_v3, %v1593_v1  ;;  %v1460_v9 = vmul.f32 %v2898_v17, %v1051_v5  ;;  %v1492_v10 = vmul.f32 %v2898_v17, %v1179_v6  ;;  %v1053_v11 = vpop.f32.mrb[33].mxu0  ;;  %v1181_v12 = vpop.f32.mrb[33].mxu1 }
 0x15c   : > { %v2433_v8 = vpack.c.bf16 %v1626_v4, %v1625_v2  ;;  %v1054_v13 = vpop.f32.mrb[34].mxu0  ;;  %v1182_v14 = vpop.f32.mrb[34].mxu1 }
 0x15d   : > { %2481 = vst [vmem:[%s2917_s15 + $0x38] sm:$0xff] %v2353_v7   ;;  %v1531_v15 = vadd.f32 %v2903_v19, %v1460_v9  ;;  %v1563_v16 = vadd.f32 %v2903_v19, %v1492_v10  ;;  %v1461_v18 = vmul.f32 %v2898_v17, %v1054_v13  ;;  %v1493_v20 = vmul.f32 %v2898_v17, %v1182_v14  ;;  %v1056_v21 = vpop.f32.mrb[35].mxu0  ;;  %v1184_v22 = vpop.f32.mrb[35].mxu1 }
 0x15e   : > { %2497 = vst [vmem:[%s2917_s15 + $0xb8] sm:$0xff] %v2433_v8  }
 0x15f   : > { %v1532_v23 = vadd.f32 %v2903_v19, %v1461_v18  ;;  %v1564_v24 = vadd.f32 %v2903_v19, %v1493_v20  ;;  %v1595_v25 = vmax.f32 %v1531_v15, 0.0  ;;  %v1627_v26 = vmax.f32 %v1563_v16, 0.0 }
 0x161   : > { %v1596_v27 = vmax.f32 %v1532_v23, 0.0  ;;  %v1628_v28 = vmax.f32 %v1564_v24, 0.0 }
 0x162   : > { %v1059_v29 = vpop.f32.mrb[36].mxu0  ;;  %v1187_v30 = vpop.f32.mrb[36].mxu1 }
 0x163   : > { %v2358_v31 = vpack.c.bf16 %v1596_v27, %v1595_v25  ;;  %v2438_v32 = vpack.c.bf16 %v1628_v28, %v1627_v26  ;;  %v1462_v33 = vmul.f32 %v2898_v17, %v1059_v29  ;;  %v1494_v34 = vmul.f32 %v2898_v17, %v1187_v30  ;;  %v1061_v35 = vpop.f32.mrb[37].mxu0  ;;  %v1189_v36 = vpop.f32.mrb[37].mxu1 }
 0x164   : > { %v1062_v37 = vpop.f32.mrb[38].mxu0  ;;  %v1190_v38 = vpop.f32.mrb[38].mxu1 }
 0x165   : > { %2482 = vst [vmem:[%s2917_s15 + $0x40] sm:$0xff] %v2358_v31   ;;  %2498 = vst [vmem:[%s2917_s15 + $0xc0] sm:$0xff] %v2438_v32   ;;  %v1533_v39 = vadd.f32 %v2903_v19, %v1462_v33  ;;  %v1565_v40 = vadd.f32 %v2903_v19, %v1494_v34  ;;  %v1463_v41 = vmul.f32 %v2898_v17, %v1062_v37  ;;  %v1064_v43 = vpop.f32.mrb[39].mxu0  ;;  %v1192_v44 = vpop.f32.mrb[39].mxu1 }
 0x166   : > { %v1495_v42 = vmul.f32 %v2898_v17, %v1190_v38 }
 0x167   : > { %v1534_v45 = vadd.f32 %v2903_v19, %v1463_v41  ;;  %v1597_v47 = vmax.f32 %v1533_v39, 0.0  ;;  %v1629_v48 = vmax.f32 %v1565_v40, 0.0 }
 0x168   : > { %v1566_v46 = vadd.f32 %v2903_v19, %v1495_v42 }
 0x169   : > { %v1598_v49 = vmax.f32 %v1534_v45, 0.0 }
 0x16a   : > { %v1630_v50 = vmax.f32 %v1566_v46, 0.0  ;;  %v1067_v51 = vpop.f32.mrb[40].mxu0  ;;  %v1195_v52 = vpop.f32.mrb[40].mxu1 }
 0x16b   : > { %v2363_v53 = vpack.c.bf16 %v1598_v49, %v1597_v47  ;;  %v1464_v55 = vmul.f32 %v2898_v17, %v1067_v51  ;;  %v1496_v56 = vmul.f32 %v2898_v17, %v1195_v52  ;;  %v1069_v57 = vpop.f32.mrb[41].mxu0  ;;  %v1197_v58 = vpop.f32.mrb[41].mxu1 }
 0x16c   : > { %v2443_v54 = vpack.c.bf16 %v1630_v50, %v1629_v48  ;;  %v1070_v59 = vpop.f32.mrb[42].mxu0  ;;  %v1198_v60 = vpop.f32.mrb[42].mxu1 }
 0x16d   : > { %2483 = vst [vmem:[%s2917_s15 + $0x48] sm:$0xff] %v2363_v53   ;;  %v1535_v61 = vadd.f32 %v2903_v19, %v1464_v55  ;;  %v1567_v62 = vadd.f32 %v2903_v19, %v1496_v56  ;;  %v1465_v63 = vmul.f32 %v2898_v17, %v1070_v59  ;;  %v1497_v0 = vmul.f32 %v2898_v17, %v1198_v60  ;;  %v1072_v1 = vpop.f32.mrb[43].mxu0  ;;  %v1200_v2 = vpop.f32.mrb[43].mxu1 }
 0x16e   : > { %2499 = vst [vmem:[%s2917_s15 + $0xc8] sm:$0xff] %v2443_v54  }
 0x16f   : > { %v1536_v3 = vadd.f32 %v2903_v19, %v1465_v63  ;;  %v1568_v4 = vadd.f32 %v2903_v19, %v1497_v0  ;;  %v1599_v5 = vmax.f32 %v1535_v61, 0.0  ;;  %v1631_v6 = vmax.f32 %v1567_v62, 0.0 }
 0x171   : > { %v1600_v7 = vmax.f32 %v1536_v3, 0.0  ;;  %v1632_v8 = vmax.f32 %v1568_v4, 0.0 }
 0x172   : > { %v1075_v9 = vpop.f32.mrb[44].mxu0  ;;  %v1203_v10 = vpop.f32.mrb[44].mxu1 }
 0x173   : > { %v2368_v11 = vpack.c.bf16 %v1600_v7, %v1599_v5  ;;  %v2448_v12 = vpack.c.bf16 %v1632_v8, %v1631_v6  ;;  %v1466_v13 = vmul.f32 %v2898_v17, %v1075_v9  ;;  %v1498_v14 = vmul.f32 %v2898_v17, %v1203_v10  ;;  %v1077_v15 = vpop.f32.mrb[45].mxu0  ;;  %v1205_v16 = vpop.f32.mrb[45].mxu1 }
 0x174   : > { %v1078_v18 = vpop.f32.mrb[46].mxu0  ;;  %v1206_v20 = vpop.f32.mrb[46].mxu1 }
 0x175   : > { %2484 = vst [vmem:[%s2917_s15 + $0x50] sm:$0xff] %v2368_v11   ;;  %2500 = vst [vmem:[%s2917_s15 + $0xd0] sm:$0xff] %v2448_v12   ;;  %v1537_v21 = vadd.f32 %v2903_v19, %v1466_v13  ;;  %v1569_v22 = vadd.f32 %v2903_v19, %v1498_v14  ;;  %v1467_v23 = vmul.f32 %v2898_v17, %v1078_v18  ;;  %v1080_v25 = vpop.f32.mrb[47].mxu0  ;;  %v1208_v26 = vpop.f32.mrb[47].mxu1 }
 0x176   : > { %v1499_v24 = vmul.f32 %v2898_v17, %v1206_v20 }
 0x177   : > { %v1538_v27 = vadd.f32 %v2903_v19, %v1467_v23  ;;  %v1601_v29 = vmax.f32 %v1537_v21, 0.0  ;;  %v1633_v30 = vmax.f32 %v1569_v22, 0.0 }
 0x178   : > { %v1570_v28 = vadd.f32 %v2903_v19, %v1499_v24 }
 0x179   : > { %v1602_v31 = vmax.f32 %v1538_v27, 0.0 }
 0x17a   : > { %v1634_v32 = vmax.f32 %v1570_v28, 0.0  ;;  %v1083_v33 = vpop.f32.mrb[48].mxu0  ;;  %v1211_v34 = vpop.f32.mrb[48].mxu1 }
 0x17b   : > { %v2373_v35 = vpack.c.bf16 %v1602_v31, %v1601_v29  ;;  %v1468_v37 = vmul.f32 %v2898_v17, %v1083_v33  ;;  %v1500_v38 = vmul.f32 %v2898_v17, %v1211_v34  ;;  %v1085_v39 = vpop.f32.mrb[49].mxu0  ;;  %v1213_v40 = vpop.f32.mrb[49].mxu1 }
 0x17c   : > { %v2453_v36 = vpack.c.bf16 %v1634_v32, %v1633_v30  ;;  %v1086_v41 = vpop.f32.mrb[50].mxu0  ;;  %v1214_v42 = vpop.f32.mrb[50].mxu1 }
 0x17d   : > { %2485 = vst [vmem:[%s2917_s15 + $0x58] sm:$0xff] %v2373_v35   ;;  %v1539_v43 = vadd.f32 %v2903_v19, %v1468_v37  ;;  %v1571_v44 = vadd.f32 %v2903_v19, %v1500_v38  ;;  %v1469_v45 = vmul.f32 %v2898_v17, %v1086_v41  ;;  %v1501_v46 = vmul.f32 %v2898_v17, %v1214_v42  ;;  %v1088_v47 = vpop.f32.mrb[51].mxu0  ;;  %v1216_v48 = vpop.f32.mrb[51].mxu1 }
 0x17e   : > { %2501 = vst [vmem:[%s2917_s15 + $0xd8] sm:$0xff] %v2453_v36  }
 0x17f   : > { %v1540_v49 = vadd.f32 %v2903_v19, %v1469_v45  ;;  %v1572_v50 = vadd.f32 %v2903_v19, %v1501_v46  ;;  %v1603_v51 = vmax.f32 %v1539_v43, 0.0  ;;  %v1635_v52 = vmax.f32 %v1571_v44, 0.0 }
 0x181   : > { %v1604_v53 = vmax.f32 %v1540_v49, 0.0  ;;  %v1636_v54 = vmax.f32 %v1572_v50, 0.0 }
 0x182   : > { %v1091_v55 = vpop.f32.mrb[52].mxu0  ;;  %v1219_v56 = vpop.f32.mrb[52].mxu1 }
 0x183   : > { %v2378_v57 = vpack.c.bf16 %v1604_v53, %v1603_v51  ;;  %v2458_v58 = vpack.c.bf16 %v1636_v54, %v1635_v52  ;;  %v1470_v59 = vmul.f32 %v2898_v17, %v1091_v55  ;;  %v1502_v60 = vmul.f32 %v2898_v17, %v1219_v56  ;;  %v1093_v61 = vpop.f32.mrb[53].mxu0  ;;  %v1221_v62 = vpop.f32.mrb[53].mxu1 }
 0x184   : > { %v1094_v63 = vpop.f32.mrb[54].mxu0  ;;  %v1222_v0 = vpop.f32.mrb[54].mxu1 }
 0x185   : > { %2486 = vst [vmem:[%s2917_s15 + $0x60] sm:$0xff] %v2378_v57   ;;  %2502 = vst [vmem:[%s2917_s15 + $0xe0] sm:$0xff] %v2458_v58   ;;  %v1541_v1 = vadd.f32 %v2903_v19, %v1470_v59  ;;  %v1573_v2 = vadd.f32 %v2903_v19, %v1502_v60  ;;  %v1471_v3 = vmul.f32 %v2898_v17, %v1094_v63  ;;  %v1096_v5 = vpop.f32.mrb[55].mxu0  ;;  %v1224_v6 = vpop.f32.mrb[55].mxu1 }
 0x186   : > { %v1503_v4 = vmul.f32 %v2898_v17, %v1222_v0 }
 0x187   : > { %v1542_v7 = vadd.f32 %v2903_v19, %v1471_v3  ;;  %v1605_v9 = vmax.f32 %v1541_v1, 0.0  ;;  %v1637_v10 = vmax.f32 %v1573_v2, 0.0 }
 0x188   : > { %v1574_v8 = vadd.f32 %v2903_v19, %v1503_v4 }
 0x189   : > { %v1606_v11 = vmax.f32 %v1542_v7, 0.0 }
 0x18a   : > { %v1638_v12 = vmax.f32 %v1574_v8, 0.0  ;;  %v1099_v13 = vpop.f32.mrb[56].mxu0  ;;  %v1227_v14 = vpop.f32.mrb[56].mxu1 }
 0x18b   : > { %v2383_v15 = vpack.c.bf16 %v1606_v11, %v1605_v9  ;;  %v1472_v18 = vmul.f32 %v2898_v17, %v1099_v13  ;;  %v1504_v20 = vmul.f32 %v2898_v17, %v1227_v14  ;;  %v1101_v21 = vpop.f32.mrb[57].mxu0  ;;  %v1229_v22 = vpop.f32.mrb[57].mxu1 }
 0x18c   : > { %v2463_v16 = vpack.c.bf16 %v1638_v12, %v1637_v10  ;;  %v1102_v23 = vpop.f32.mrb[58].mxu0  ;;  %v1230_v24 = vpop.f32.mrb[58].mxu1 }
 0x18d   : > { %2487 = vst [vmem:[%s2917_s15 + $0x68] sm:$0xff] %v2383_v15   ;;  %v1543_v25 = vadd.f32 %v2903_v19, %v1472_v18  ;;  %v1575_v26 = vadd.f32 %v2903_v19, %v1504_v20  ;;  %v1473_v27 = vmul.f32 %v2898_v17, %v1102_v23  ;;  %v1505_v28 = vmul.f32 %v2898_v17, %v1230_v24  ;;  %v1104_v29 = vpop.f32.mrb[59].mxu0  ;;  %v1232_v30 = vpop.f32.mrb[59].mxu1 }
 0x18e   : > { %2503 = vst [vmem:[%s2917_s15 + $0xe8] sm:$0xff] %v2463_v16  }
 0x18f   : > { %v1544_v31 = vadd.f32 %v2903_v19, %v1473_v27  ;;  %v1576_v32 = vadd.f32 %v2903_v19, %v1505_v28  ;;  %v1607_v33 = vmax.f32 %v1543_v25, 0.0  ;;  %v1639_v34 = vmax.f32 %v1575_v26, 0.0 }
 0x191   : > { %v1608_v35 = vmax.f32 %v1544_v31, 0.0  ;;  %v1640_v36 = vmax.f32 %v1576_v32, 0.0 }
 0x192   : > { %v1107_v37 = vpop.f32.mrb[60].mxu0  ;;  %v1235_v38 = vpop.f32.mrb[60].mxu1 }
 0x193   : > { %v2388_v39 = vpack.c.bf16 %v1608_v35, %v1607_v33  ;;  %v2468_v40 = vpack.c.bf16 %v1640_v36, %v1639_v34  ;;  %v1474_v41 = vmul.f32 %v2898_v17, %v1107_v37  ;;  %v1506_v42 = vmul.f32 %v2898_v17, %v1235_v38  ;;  %v1109_v43 = vpop.f32.mrb[61].mxu0  ;;  %v1237_v44 = vpop.f32.mrb[61].mxu1 }
 0x194   : > { %v1110_v45 = vpop.f32.mrb[62].mxu0  ;;  %v1238_v46 = vpop.f32.mrb[62].mxu1 }
 0x195   : > { %2488 = vst [vmem:[%s2917_s15 + $0x70] sm:$0xff] %v2388_v39   ;;  %2504 = vst [vmem:[%s2917_s15 + $0xf0] sm:$0xff] %v2468_v40   ;;  %v1545_v47 = vadd.f32 %v2903_v19, %v1474_v41  ;;  %v1577_v48 = vadd.f32 %v2903_v19, %v1506_v42  ;;  %v1475_v49 = vmul.f32 %v2898_v17, %v1110_v45  ;;  %v1112_v51 = vpop.f32.mrb[63].mxu0  ;;  %v1240_v52 = vpop.f32.mrb[63].mxu1 }
 0x196   : > { %v1507_v50 = vmul.f32 %v2898_v17, %v1238_v46 }
 0x197   : > { %v1546_v53 = vadd.f32 %v2903_v19, %v1475_v49  ;;  %v1609_v55 = vmax.f32 %v1545_v47, 0.0  ;;  %v1641_v56 = vmax.f32 %v1577_v48, 0.0 }
 0x198   : > { %v1578_v54 = vadd.f32 %v2903_v19, %v1507_v50 }
 0x199   : > { %v1610_v57 = vmax.f32 %v1546_v53, 0.0 }
 0x19a   : > { %v1642_v58 = vmax.f32 %v1578_v54, 0.0 }
 0x19b   : > { %v2393_v59 = vpack.c.bf16 %v1610_v57, %v1609_v55 }
 0x19c   : > { %v2473_v60 = vpack.c.bf16 %v1642_v58, %v1641_v56 }
 0x19d   : > { %2489 = vst [vmem:[%s2917_s15 + $0x78] sm:$0xff] %v2393_v59  }
 0x19e   : > { %2505 = vst [vmem:[%s2917_s15 + $0xf8] sm:$0xff] %v2473_v60  }
 0x19f PF: > { %s14_s17 = sadd.s32 1, %s2697_s17   ;;  %s3085_s15 = smov %s2693_s16 }
 0x1a0   : > { %p11_p5 = scmp.ge.s32.totalorder %s14_s17, 6   ;;  %s3086_s16 = smov %s3088_s18 }
 0x1a2   :  { %13 = sbr.rel (!%p11_p5) target bundleno = 2 (0x2), region = 83 }

</bundles_post_ra>
